<compile_context>
chip_gen: v6e
topology: v6e:2x2x1
jax: 0.10.0
libtpu: 0.0.40
codegen_flags: <defaults>
</compile_context>

<pallas_src>
import numpy as np
import jax
import jax.numpy as jnp
from jax.experimental import pallas as pl
from jax.experimental.pallas import tpu as pltpu

_BIG = 1e30  # additive mask magnitude (finite, exp(-_BIG) underflows to 0)


def _round_up(x, m):
    return ((x + m - 1) // m) * m


def _make_decoder_kernel(n_cat, eps=1e-6):
    """Kernel: PReLU -> (eval) Dropout -> LayerNorm -> packed linear heads
    (one bf16 MXU matmul, f32 accumulation) -> per-head softmax on the
    categorical lane ranges (masks are precomputed inputs)."""

    def kernel(alpha_ref, z_ref, lnw_ref, lnb_ref, w_ref, b_ref,
               negm_ref, selm_ref, offs_ref, o_ref):
        x = z_ref[...].astype(jnp.float32)                       # (TR, F)

        # PReLU (single shared parameter, PyTorch default num_parameters=1)
        x = jnp.where(x > 0.0, x, alpha_ref[...] * x)

        # TODO(synk): Dropout(p=0.5) is implemented as identity (eval-mode
        # semantics); training-mode stochastic dropout is omitted.

        # LayerNorm over features, eps=1e-6, one-pass moments (f32 math).
        mu = jnp.mean(x, axis=-1, keepdims=True)
        ex2 = jnp.mean(x * x, axis=-1, keepdims=True)
        var = ex2 - mu * mu
        xhat = (x - mu) * jax.lax.rsqrt(var + eps)
        x = xhat * lnw_ref[...] + lnb_ref[...]                   # (TR, F)

        # All reverse-embedding heads as one MXU matmul: bf16 operands,
        # f32 accumulation, lane-dense (128-padded) output width.
        y = jnp.dot(x.astype(jnp.bfloat16), w_ref[...],
                    preferred_element_type=jnp.float32) + b_ref[...]  # (TR, OUT_PAD)

        # Softmax over each categorical head's lane range, using precomputed
        # masks:  negm[h] = 0 on head-h lanes / -BIG elsewhere (max source),
        #         selm[h] = 1 on head-h lanes / 0 elsewhere,
        #         offs    = 0 on categorical lanes / +BIG elsewhere
        # so exp(y - m_b) underflows to exactly 0 on non-categorical lanes.
        if n_cat:
            m_b = offs_ref[...]                                  # (1, OUT_PAD)
            for h in range(n_cat):
                mx = jnp.max(y + negm_ref[h:h + 1, :], axis=1, keepdims=True)
                m_b = jnp.where(selm_ref[h:h + 1, :] != 0.0, mx, m_b)
            e = jnp.exp(y - m_b)                                 # one shared exp pass
            d_b = 1.0
            for h in range(n_cat):
                s = jnp.sum(e * selm_ref[h:h + 1, :], axis=1, keepdims=True)
                d_b = jnp.where(selm_ref[h:h + 1, :] != 0.0, s, d_b)
            y = jnp.where(offs_ref[...] == 0.0,
                          e * pl.reciprocal(d_b, approx=True), y)

        o_ref[...] = y.astype(o_ref.dtype)                       # unmasked 128-lane store

    return kernel


def build_decoder(feat_dim, head_slices, categorical_dims, *,
                  row_tile=512, out_dtype=jnp.bfloat16):
    """Returns (prepare_params, forward) where prepare_params is the one-time
    weight/mask prep and forward is a jitted function (z, prep) -> packed
    output of shape (N, S, total_out)."""
    total_out = sum(sz for _, sz in head_slices)
    out_pad = max(_round_up(total_out, 128), 128)   # lane-dense output width
    cat_heads = [(s, sz) for i, (s, sz) in enumerate(head_slices)
                 if i in categorical_dims]
    n_cat = len(cat_heads)
    n_mask_rows = max(n_cat, 1)

    kernel = _make_decoder_kernel(n_cat)

    def prepare_params(params):
        # One-time (init-time) prep: pad + cast + reshape, hoisted out of the
        # per-call hot path.
        pad = out_pad - total_out
        w_pad = jnp.pad(jnp.asarray(params["w_packed"], jnp.float32),
                        ((0, 0), (0, pad))).astype(jnp.bfloat16)       # (F, OUT_PAD)
        b_pad = jnp.pad(jnp.asarray(params["b_packed"], jnp.float32)
                        .reshape(1, total_out), ((0, 0), (0, pad)))    # (1, OUT_PAD)

        negm = np.full((n_mask_rows, out_pad), -_BIG, np.float32)
        selm = np.zeros((n_mask_rows, out_pad), np.float32)
        offs = np.full((1, out_pad), _BIG, np.float32)
        for h, (s, sz) in enumerate(cat_heads):
            negm[h, s:s + sz] = 0.0
            selm[h, s:s + sz] = 1.0
            offs[0, s:s + sz] = 0.0

        return {
            "alpha": jnp.asarray(params["prelu_alpha"], jnp.float32).reshape(1, 1),
            "lnw": jnp.asarray(params["ln_weight"], jnp.float32).reshape(1, feat_dim),
            "lnb": jnp.asarray(params["ln_bias"], jnp.float32).reshape(1, feat_dim),
            "w_pad": w_pad,
            "b_pad": b_pad,
            "negm": jnp.asarray(negm),
            "selm": jnp.asarray(selm),
            "offs": jnp.asarray(offs),
        }

    def forward(z, prep):
        N, S, F = z.shape
        R = N * S
        z2d = z.reshape(R, F)

        tr = max(8, min(row_tile, _round_up(R, 8)))
        grid = (pl.cdiv(R, tr),)
        const = lambda i: (0, 0)

        packed_pad = pl.pallas_call(
            kernel,
            out_shape=jax.ShapeDtypeStruct((R, out_pad), out_dtype),
            grid=grid,
            in_specs=[
                pl.BlockSpec((1, 1), const),                    # prelu alpha
                pl.BlockSpec((tr, F), lambda i: (i, 0)),        # z rows (bf16 or f32)
                pl.BlockSpec((1, F), const),                    # LN weight
                pl.BlockSpec((1, F), const),                    # LN bias
                pl.BlockSpec((F, out_pad), const),              # packed W (bf16)
                pl.BlockSpec((1, out_pad), const),              # packed bias
                pl.BlockSpec((n_mask_rows, out_pad), const),    # additive max masks
                pl.BlockSpec((n_mask_rows, out_pad), const),    # 0/1 select masks
                pl.BlockSpec((1, out_pad), const),              # +BIG lane offsets
            ],
            out_specs=pl.BlockSpec((tr, out_pad), lambda i: (i, 0)),
            compiler_params=pltpu.CompilerParams(
                dimension_semantics=("parallel",),
                vmem_limit_bytes=32 * 1024 * 1024),
        )(prep["alpha"], z2d, prep["lnw"], prep["lnb"], prep["w_pad"],
          prep["b_pad"], prep["negm"], prep["selm"], prep["offs"])

        return packed_pad[:, :total_out].reshape(N, S, total_out)

    return prepare_params, jax.jit(forward)


def reference_packed(z, params, head_slices, categorical_dims, eps=1e-6):
    """Pure-JAX reference of the same (eval-mode) forward, mirroring the
    kernel's bf16 matmul operands, for verification."""
    a = params["prelu_alpha"]
    x = z.astype(jnp.float32)
    x = jnp.where(x > 0, x, a * x)
    mu = x.mean(-1, keepdims=True)
    var = jnp.square(x - mu).mean(-1, keepdims=True)
    xhat = (x - mu) / jnp.sqrt(var + eps)
    x = xhat * params["ln_weight"] + params["ln_bias"]
    y = jnp.dot(x.astype(jnp.bfloat16),
                params["w_packed"].astype(jnp.bfloat16),
                preferred_element_type=jnp.float32) + params["b_packed"]
    for i, (start, sz) in enumerate(head_slices):
        if i in categorical_dims:
            seg = jax.nn.softmax(y[..., start:start + sz], axis=-1)
            y = y.at[..., start:start + sz].set(seg)
    return y


def init_params(key, feat_dim, head_sizes):
    """Deterministic init matching PyTorch defaults + xavier_uniform_ weights."""
    keys = jax.random.split(key, 2 * len(head_sizes))
    w_cols, b_cols = [], []
    for i, out_dim in enumerate(head_sizes):
        bound_w = float(np.sqrt(6.0 / (feat_dim + out_dim)))
        w = jax.random.uniform(keys[2 * i], (feat_dim, out_dim),
                               minval=-bound_w, maxval=bound_w, dtype=jnp.float32)
        bound_b = float(1.0 / np.sqrt(feat_dim))
        b = jax.random.uniform(keys[2 * i + 1], (out_dim,),
                               minval=-bound_b, maxval=bound_b, dtype=jnp.float32)
        w_cols.append(w)
        b_cols.append(b)
    return {
        "prelu_alpha": jnp.float32(0.25),                      # nn.PReLU default
        "ln_weight": jnp.ones((feat_dim,), jnp.float32),       # nn.LayerNorm default
        "ln_bias": jnp.zeros((feat_dim,), jnp.float32),
        "w_packed": jnp.concatenate(w_cols, axis=1),           # (F, total_out)
        "b_packed": jnp.concatenate(b_cols, axis=0),           # (total_out,)
    }


if __name__ == "__main__":
    # Small, deterministic problem consistent with the module:
    #   z: (N, S, feat_dim); 4 hyperparameters, two of them categorical.
    feat_dim = 32
    N, S = 2, 8
    bounds = [
        {"name": "lr", "type": "continuous", "domain": (1e-4, 1e-1)},
        {"name": "optimizer", "type": "categorical", "domain": (0, 1, 2)},
        {"name": "weight_decay", "type": "continuous", "domain": (0.0, 0.1)},
        {"name": "activation", "type": "categorical", "domain": (0, 1, 2, 3, 4)},
    ]
    categorical_dims = [1, 3]

    head_sizes = [len(b["domain"]) if i in categorical_dims else 1
                  for i, b in enumerate(bounds)]
    starts = np.concatenate([[0], np.cumsum(head_sizes)[:-1]]).tolist()
    head_slices = list(zip(starts, head_sizes))                # [(0,1),(1,3),(4,1),(5,5)]

    key = jax.random.PRNGKey(0)
    k_z, k_h, k_p = jax.random.split(key, 3)
    # Activations kept bf16 upstream (halves the kernel's dominant HBM read).
    z = jax.random.normal(k_z, (N, S, feat_dim), dtype=jnp.float32).astype(jnp.bfloat16)
    h_i = jax.random.normal(k_h, (N, feat_dim), dtype=jnp.float32)  # unused, as in PyTorch
    params = init_params(k_p, feat_dim, head_sizes)

    prepare_params, decoder_forward = build_decoder(feat_dim, head_slices, categorical_dims)
    prep = prepare_params(params)          # one-time weight/mask prep (hoisted)

    packed = decoder_forward(z, prep)      # jitted; single pallas_call
    packed = jax.block_until_ready(packed)

    ref = reference_packed(z, params, head_slices, categorical_dims)
    packed_np = np.asarray(packed.astype(jnp.float32))
    # Tolerance covers bf16 input/output + bf16 MXU operands + approx reciprocal.
    np.testing.assert_allclose(packed_np, np.asarray(ref), rtol=1e-2, atol=1e-2)

    # List-of-lists structure check done host-side (no per-(n, head) device slices).
    output = [[packed_np[n, :, s:s + sz] for (s, sz) in head_slices] for n in range(N)]
    assert len(output) == N and all(len(o) == len(bounds) for o in output)
    assert output[0][1].shape == (S, 3) and output[0][0].shape == (S, 1)

    print("KERNEL_OK")
</pallas_src>

<mosaic_0001>
module attributes {stable_mosaic.version = 11 : i64} {
  func.func @kernel(%arg0: i32, %arg1: memref<1x1xf32, #tpu.memory_space<vmem>>, %arg2: memref<16x32xbf16, #tpu.memory_space<vmem>>, %arg3: memref<1x32xf32, #tpu.memory_space<vmem>>, %arg4: memref<1x32xf32, #tpu.memory_space<vmem>>, %arg5: memref<32x128xbf16, #tpu.memory_space<vmem>>, %arg6: memref<1x128xf32, #tpu.memory_space<vmem>>, %arg7: memref<2x128xf32, #tpu.memory_space<vmem>>, %arg8: memref<2x128xf32, #tpu.memory_space<vmem>>, %arg9: memref<1x128xf32, #tpu.memory_space<vmem>>, %arg10: memref<16x128xbf16, #tpu.memory_space<vmem>>) attributes {dimension_semantics = [#tpu.dimension_semantics<parallel>], iteration_bounds = array<i64: 1>, scalar_prefetch = 0 : i64, scratch_operands = 0 : i64, tpu.core_type = #tpu.core_type<tc>, window_params = [{pipeline_mode = #tpu.pipeline_mode<synchronous>, transform_indices = @transform_0, window_bounds = array<i64: 1, 1>}, {transform_indices = @transform_1, window_bounds = array<i64: 16, 32>}, {pipeline_mode = #tpu.pipeline_mode<synchronous>, transform_indices = @transform_2, window_bounds = array<i64: 1, 32>}, {pipeline_mode = #tpu.pipeline_mode<synchronous>, transform_indices = @transform_3, window_bounds = array<i64: 1, 32>}, {pipeline_mode = #tpu.pipeline_mode<synchronous>, transform_indices = @transform_4, window_bounds = array<i64: 32, 128>}, {pipeline_mode = #tpu.pipeline_mode<synchronous>, transform_indices = @transform_5, window_bounds = array<i64: 1, 128>}, {pipeline_mode = #tpu.pipeline_mode<synchronous>, transform_indices = @transform_6, window_bounds = array<i64: 2, 128>}, {pipeline_mode = #tpu.pipeline_mode<synchronous>, transform_indices = @transform_7, window_bounds = array<i64: 2, 128>}, {pipeline_mode = #tpu.pipeline_mode<synchronous>, transform_indices = @transform_8, window_bounds = array<i64: 1, 128>}, {transform_indices = @transform_9, window_bounds = array<i64: 16, 128>}]} {
    %c0 = arith.constant 0 : index
    %c0_0 = arith.constant 0 : index
    %0 = vector.load %arg2[%c0, %c0_0] : memref<16x32xbf16, #tpu.memory_space<vmem>>, vector<16x32xbf16>
    %1 = arith.extf %0 : vector<16x32xbf16> to vector<16x32xf32>
    %cst = arith.constant 0.000000e+00 : f32
    %2 = vector.broadcast %cst : f32 to vector<16x32xf32>
    %3 = arith.cmpf ogt, %1, %2 : vector<16x32xf32>
    %c0_1 = arith.constant 0 : index
    %c0_2 = arith.constant 0 : index
    %4 = vector.load %arg1[%c0_1, %c0_2] : memref<1x1xf32, #tpu.memory_space<vmem>>, vector<1x1xf32>
    %5 = vector.broadcast %4 : vector<1x1xf32> to vector<16x32xf32>
    %6 = arith.mulf %5, %1 : vector<16x32xf32>
    %7 = arith.select %3, %1, %6 : vector<16x32xi1>, vector<16x32xf32>
    %cst_3 = arith.constant dense<0.000000e+00> : vector<16xf32>
    %8 = vector.multi_reduction <add>, %7, %cst_3 [1] : vector<16x32xf32> to vector<16xf32>
    %9 = vector.shape_cast %8 : vector<16xf32> to vector<16x1xf32>
    %cst_4 = arith.constant 3.200000e+01 : f32
    %10 = vector.broadcast %cst_4 : f32 to vector<16x1xf32>
    %11 = arith.divf %9, %10 : vector<16x1xf32>
    %12 = arith.mulf %7, %7 : vector<16x32xf32>
    %cst_5 = arith.constant dense<0.000000e+00> : vector<16xf32>
    %13 = vector.multi_reduction <add>, %12, %cst_5 [1] : vector<16x32xf32> to vector<16xf32>
    %14 = vector.shape_cast %13 : vector<16xf32> to vector<16x1xf32>
    %cst_6 = arith.constant 3.200000e+01 : f32
    %15 = vector.broadcast %cst_6 : f32 to vector<16x1xf32>
    %16 = arith.divf %14, %15 : vector<16x1xf32>
    %17 = arith.mulf %11, %11 : vector<16x1xf32>
    %18 = arith.subf %16, %17 : vector<16x1xf32>
    %19 = vector.broadcast %11 : vector<16x1xf32> to vector<16x32xf32>
    %20 = arith.subf %7, %19 : vector<16x32xf32>
    %cst_7 = arith.constant 9.99999997E-7 : f32
    %21 = vector.broadcast %cst_7 : f32 to vector<16x1xf32>
    %22 = arith.addf %18, %21 : vector<16x1xf32>
    %23 = math.rsqrt %22 : vector<16x1xf32>
    %24 = vector.broadcast %23 : vector<16x1xf32> to vector<16x32xf32>
    %25 = arith.mulf %20, %24 : vector<16x32xf32>
    %c0_8 = arith.constant 0 : index
    %c0_9 = arith.constant 0 : index
    %26 = vector.load %arg3[%c0_8, %c0_9] : memref<1x32xf32, #tpu.memory_space<vmem>>, vector<1x32xf32>
    %27 = vector.broadcast %26 : vector<1x32xf32> to vector<16x32xf32>
    %28 = arith.mulf %25, %27 : vector<16x32xf32>
    %c0_10 = arith.constant 0 : index
    %c0_11 = arith.constant 0 : index
    %29 = vector.load %arg4[%c0_10, %c0_11] : memref<1x32xf32, #tpu.memory_space<vmem>>, vector<1x32xf32>
    %30 = vector.broadcast %29 : vector<1x32xf32> to vector<16x32xf32>
    %31 = arith.addf %28, %30 : vector<16x32xf32>
    %32 = arith.truncf %31 : vector<16x32xf32> to vector<16x32xbf16>
    %c0_12 = arith.constant 0 : index
    %c0_13 = arith.constant 0 : index
    %33 = vector.load %arg5[%c0_12, %c0_13] : memref<32x128xbf16, #tpu.memory_space<vmem>>, vector<32x128xbf16>
    %cst_14 = arith.constant dense<0.000000e+00> : vector<16x128xf32>
    %34 = tpu.matmul %32, %33, %cst_14 {dimension_numbers = #tpu.dot_dimension_numbers<[1], [0], [0], [1], [0, 0, 1, 1], [], []>} : vector<16x32xbf16>, vector<32x128xbf16>, vector<16x128xf32> -> vector<16x128xf32>
    %c0_15 = arith.constant 0 : index
    %c0_16 = arith.constant 0 : index
    %35 = vector.load %arg6[%c0_15, %c0_16] : memref<1x128xf32, #tpu.memory_space<vmem>>, vector<1x128xf32>
    %36 = vector.broadcast %35 : vector<1x128xf32> to vector<16x128xf32>
    %37 = arith.addf %34, %36 : vector<16x128xf32>
    %c0_17 = arith.constant 0 : index
    %c0_18 = arith.constant 0 : index
    %38 = vector.load %arg9[%c0_17, %c0_18] : memref<1x128xf32, #tpu.memory_space<vmem>>, vector<1x128xf32>
    %c0_19 = arith.constant 0 : index
    %c0_20 = arith.constant 0 : index
    %39 = vector.load %arg7[%c0_19, %c0_20] : memref<2x128xf32, #tpu.memory_space<vmem>>, vector<1x128xf32>
    %40 = vector.broadcast %39 : vector<1x128xf32> to vector<16x128xf32>
    %41 = arith.addf %37, %40 : vector<16x128xf32>
    %cst_21 = arith.constant dense<0xFF800000> : vector<16xf32>
    %42 = vector.multi_reduction <maximumf>, %41, %cst_21 [1] : vector<16x128xf32> to vector<16xf32>
    %43 = vector.shape_cast %42 : vector<16xf32> to vector<16x1xf32>
    %c0_22 = arith.constant 0 : index
    %c0_23 = arith.constant 0 : index
    %44 = vector.load %arg8[%c0_22, %c0_23] : memref<2x128xf32, #tpu.memory_space<vmem>>, vector<1x128xf32>
    %cst_24 = arith.constant 0.000000e+00 : f32
    %45 = vector.broadcast %cst_24 : f32 to vector<1x128xf32>
    %46 = arith.cmpf one, %44, %45 : vector<1x128xf32>
    %47 = vector.shape_cast %46 : vector<1x128xi1> to vector<1x128xi1>
    %48 = vector.broadcast %47 : vector<1x128xi1> to vector<16x128xi1>
    %49 = vector.shape_cast %43 : vector<16x1xf32> to vector<16x1xf32>
    %50 = vector.broadcast %49 : vector<16x1xf32> to vector<16x128xf32>
    %51 = vector.shape_cast %38 : vector<1x128xf32> to vector<1x128xf32>
    %52 = vector.broadcast %51 : vector<1x128xf32> to vector<16x128xf32>
    %53 = arith.select %48, %50, %52 : vector<16x128xi1>, vector<16x128xf32>
    %c1 = arith.constant 1 : index
    %c0_25 = arith.constant 0 : index
    %54 = vector.load %arg7[%c1, %c0_25] : memref<2x128xf32, #tpu.memory_space<vmem>>, vector<1x128xf32>
    %55 = vector.broadcast %54 : vector<1x128xf32> to vector<16x128xf32>
    %56 = arith.addf %37, %55 : vector<16x128xf32>
    %cst_26 = arith.constant dense<0xFF800000> : vector<16xf32>
    %57 = vector.multi_reduction <maximumf>, %56, %cst_26 [1] : vector<16x128xf32> to vector<16xf32>
    %58 = vector.shape_cast %57 : vector<16xf32> to vector<16x1xf32>
    %c1_27 = arith.constant 1 : index
    %c0_28 = arith.constant 0 : index
    %59 = vector.load %arg8[%c1_27, %c0_28] : memref<2x128xf32, #tpu.memory_space<vmem>>, vector<1x128xf32>
    %cst_29 = arith.constant 0.000000e+00 : f32
    %60 = vector.broadcast %cst_29 : f32 to vector<1x128xf32>
    %61 = arith.cmpf one, %59, %60 : vector<1x128xf32>
    %62 = vector.shape_cast %61 : vector<1x128xi1> to vector<1x128xi1>
    %63 = vector.broadcast %62 : vector<1x128xi1> to vector<16x128xi1>
    %64 = vector.shape_cast %58 : vector<16x1xf32> to vector<16x1xf32>
    %65 = vector.broadcast %64 : vector<16x1xf32> to vector<16x128xf32>
    %66 = arith.select %63, %65, %53 : vector<16x128xi1>, vector<16x128xf32>
    %67 = arith.subf %37, %66 : vector<16x128xf32>
    %68 = math.exp %67 : vector<16x128xf32>
    %c0_30 = arith.constant 0 : index
    %c0_31 = arith.constant 0 : index
    %69 = vector.load %arg8[%c0_30, %c0_31] : memref<2x128xf32, #tpu.memory_space<vmem>>, vector<1x128xf32>
    %70 = vector.broadcast %69 : vector<1x128xf32> to vector<16x128xf32>
    %71 = arith.mulf %68, %70 : vector<16x128xf32>
    %cst_32 = arith.constant dense<0.000000e+00> : vector<16xf32>
    %72 = vector.multi_reduction <add>, %71, %cst_32 [1] : vector<16x128xf32> to vector<16xf32>
    %73 = vector.shape_cast %72 : vector<16xf32> to vector<16x1xf32>
    %c0_33 = arith.constant 0 : index
    %c0_34 = arith.constant 0 : index
    %74 = vector.load %arg8[%c0_33, %c0_34] : memref<2x128xf32, #tpu.memory_space<vmem>>, vector<1x128xf32>
    %cst_35 = arith.constant 0.000000e+00 : f32
    %75 = vector.broadcast %cst_35 : f32 to vector<1x128xf32>
    %76 = arith.cmpf one, %74, %75 : vector<1x128xf32>
    %cst_36 = arith.constant 1.000000e+00 : f32
    %77 = vector.shape_cast %76 : vector<1x128xi1> to vector<1x128xi1>
    %78 = vector.broadcast %77 : vector<1x128xi1> to vector<16x128xi1>
    %79 = vector.shape_cast %73 : vector<16x1xf32> to vector<16x1xf32>
    %80 = vector.broadcast %79 : vector<16x1xf32> to vector<16x128xf32>
    %81 = vector.broadcast %cst_36 : f32 to vector<16x128xf32>
    %82 = arith.select %78, %80, %81 : vector<16x128xi1>, vector<16x128xf32>
    %c1_37 = arith.constant 1 : index
    %c0_38 = arith.constant 0 : index
    %83 = vector.load %arg8[%c1_37, %c0_38] : memref<2x128xf32, #tpu.memory_space<vmem>>, vector<1x128xf32>
    %84 = vector.broadcast %83 : vector<1x128xf32> to vector<16x128xf32>
    %85 = arith.mulf %68, %84 : vector<16x128xf32>
    %cst_39 = arith.constant dense<0.000000e+00> : vector<16xf32>
    %86 = vector.multi_reduction <add>, %85, %cst_39 [1] : vector<16x128xf32> to vector<16xf32>
    %87 = vector.shape_cast %86 : vector<16xf32> to vector<16x1xf32>
    %c1_40 = arith.constant 1 : index
    %c0_41 = arith.constant 0 : index
    %88 = vector.load %arg8[%c1_40, %c0_41] : memref<2x128xf32, #tpu.memory_space<vmem>>, vector<1x128xf32>
    %cst_42 = arith.constant 0.000000e+00 : f32
    %89 = vector.broadcast %cst_42 : f32 to vector<1x128xf32>
    %90 = arith.cmpf one, %88, %89 : vector<1x128xf32>
    %91 = vector.shape_cast %90 : vector<1x128xi1> to vector<1x128xi1>
    %92 = vector.broadcast %91 : vector<1x128xi1> to vector<16x128xi1>
    %93 = vector.shape_cast %87 : vector<16x1xf32> to vector<16x1xf32>
    %94 = vector.broadcast %93 : vector<16x1xf32> to vector<16x128xf32>
    %95 = arith.select %92, %94, %82 : vector<16x128xi1>, vector<16x128xf32>
    %c0_43 = arith.constant 0 : index
    %c0_44 = arith.constant 0 : index
    %96 = vector.load %arg9[%c0_43, %c0_44] : memref<1x128xf32, #tpu.memory_space<vmem>>, vector<1x128xf32>
    %cst_45 = arith.constant 0.000000e+00 : f32
    %97 = vector.broadcast %cst_45 : f32 to vector<1x128xf32>
    %98 = arith.cmpf oeq, %96, %97 : vector<1x128xf32>
    %99 = tpu.reciprocal %95 {approx = true} : vector<16x128xf32> -> vector<16x128xf32>
    %100 = arith.mulf %68, %99 : vector<16x128xf32>
    %101 = vector.shape_cast %98 : vector<1x128xi1> to vector<1x128xi1>
    %102 = vector.broadcast %101 : vector<1x128xi1> to vector<16x128xi1>
    %103 = arith.select %102, %100, %37 : vector<16x128xi1>, vector<16x128xf32>
    %104 = arith.truncf %103 : vector<16x128xf32> to vector<16x128xbf16>
    %c0_46 = arith.constant 0 : index
    %c0_47 = arith.constant 0 : index
    %105 = vector.load %arg10[%c0_46, %c0_47] : memref<16x128xbf16, #tpu.memory_space<vmem>>, vector<16x128xbf16>
    tpu.vector_store %arg10[%c0_46, %c0_47], %104 {strides = array<i32>} : memref<16x128xbf16, #tpu.memory_space<vmem>>, vector<16x128xbf16>,
    return
  }
  func.func @transform_0(%arg0: i32) -> (i32, i32) {
    %c0_i32 = arith.constant 0 : i32
    %c0_i32_0 = arith.constant 0 : i32
    %c0_i32_1 = arith.constant 0 : i32
    return %c0_i32, %c0_i32_0 : i32, i32
  }
  func.func @transform_1(%arg0: i32) -> (i32, i32) {
    %c0_i32 = arith.constant 0 : i32
    %c0_i32_0 = arith.constant 0 : i32
    return %arg0, %c0_i32 : i32, i32
  }
  func.func @transform_2(%arg0: i32) -> (i32, i32) {
    %c0_i32 = arith.constant 0 : i32
    %c0_i32_0 = arith.constant 0 : i32
    %c0_i32_1 = arith.constant 0 : i32
    return %c0_i32, %c0_i32_0 : i32, i32
  }
  func.func @transform_3(%arg0: i32) -> (i32, i32) {
    %c0_i32 = arith.constant 0 : i32
    %c0_i32_0 = arith.constant 0 : i32
    %c0_i32_1 = arith.constant 0 : i32
    return %c0_i32, %c0_i32_0 : i32, i32
  }
  func.func @transform_4(%arg0: i32) -> (i32, i32) {
    %c0_i32 = arith.constant 0 : i32
    %c0_i32_0 = arith.constant 0 : i32
    %c0_i32_1 = arith.constant 0 : i32
    return %c0_i32, %c0_i32_0 : i32, i32
  }
  func.func @transform_5(%arg0: i32) -> (i32, i32) {
    %c0_i32 = arith.constant 0 : i32
    %c0_i32_0 = arith.constant 0 : i32
    %c0_i32_1 = arith.constant 0 : i32
    return %c0_i32, %c0_i32_0 : i32, i32
  }
  func.func @transform_6(%arg0: i32) -> (i32, i32) {
    %c0_i32 = arith.constant 0 : i32
    %c0_i32_0 = arith.constant 0 : i32
    %c0_i32_1 = arith.constant 0 : i32
    return %c0_i32, %c0_i32_0 : i32, i32
  }
  func.func @transform_7(%arg0: i32) -> (i32, i32) {
    %c0_i32 = arith.constant 0 : i32
    %c0_i32_0 = arith.constant 0 : i32
    %c0_i32_1 = arith.constant 0 : i32
    return %c0_i32, %c0_i32_0 : i32, i32
  }
  func.func @transform_8(%arg0: i32) -> (i32, i32) {
    %c0_i32 = arith.constant 0 : i32
    %c0_i32_0 = arith.constant 0 : i32
    %c0_i32_1 = arith.constant 0 : i32
    return %c0_i32, %c0_i32_0 : i32, i32
  }
  func.func @transform_9(%arg0: i32) -> (i32, i32) {
    %c0_i32 = arith.constant 0 : i32
    %c0_i32_0 = arith.constant 0 : i32
    return %arg0, %c0_i32 : i32, i32
  }
}

</mosaic_0001>

<bundles_post_ra>
// kernel: forward.1
= control target key start
LH: loop header
LB: loop body
LE: loop exit
PB: predicated region body
PF: predicated region fallthrough
CT: control target
= control target key end

     0   :  { %s714_s0 = inlined_call_operand.<no memory space> [shape: f32[1,1], index: 0, kind: input, shape index: {}]   ;;  %s715_s1 = inlined_call_operand.hbm [shape: bf16[16,32], index: 1, kind: input, shape index: {}]   ;;  %s716_s2 = inlined_call_operand.hbm [shape: f32[1,32], index: 2, kind: input, shape index: {}]   ;;  %s717_s3 = inlined_call_operand.hbm [shape: f32[1,32], index: 3, kind: input, shape index: {}]   ;;  %s718_s4 = inlined_call_operand.vmem [shape: bf16[32,128], index: 4, kind: input, shape index: {}]   ;;  %s719_s5 = inlined_call_operand.hbm [shape: f32[1,128], index: 5, kind: input, shape index: {}]   ;;  %s720_s6 = inlined_call_operand.hbm [shape: f32[2,128], index: 6, kind: input, shape index: {}]   ;;  %s721_s7 = inlined_call_operand.hbm [shape: f32[2,128], index: 7, kind: input, shape index: {}]   ;;  %s722_s8 = inlined_call_operand.hbm [shape: f32[1,128], index: 8, kind: input, shape index: {}]   ;;  %s723_s9 = inlined_call_operand.vmem [shape: bf16[16,128], index: 9, kind: output, shape index: {}]  }
   0x1   :  { %v14_v0 = vstv %s714_s0 }
   0x2   :  { %15 = vst [vmem:[#allocation2] sm:$0x1] %v14_v0 }
   0x3   :  { %16 = vsyncpa [#allocation4], 0 }
   0x4   :  { %17 = vsyncpa [#allocation6], 0 }
   0x5   :  { %18 = vsyncpa [#allocation9], 0 }
   0x6   :  { %19 = vsyncpa [#allocation12], 0  ;;  %s574_s11 = smov [#allocation5]   ;;  %s575_s13 = smov [#allocation8]  }
   0x7   :  { %s40_s12 = sshll.u32 %s574_s11, 4  ;;  %s62_s14 = sshll.u32 %s575_s13, 4  ;;  %s41_s12 = int_to_ptr.vmem [resolvable:$true] %s40_s12  ;;  %s63_s14 = int_to_ptr.vmem [resolvable:$true] %s62_s14 }
   0x8   :  { %s434_s15 = scalar_lea.vmem %s41_s12, 16  ;;  %s438_s16 = scalar_lea.vmem %s41_s12, 32 }
   0x9   :  { %p435_p0 = scmp.ne.s32.totalorder %s41_s12, %s434_s15  ;;  %p439_p1 = scmp.lt.s32.totalorder %s41_s12, %s41_s12 }
   0xa   :  { %p440_p2 = scmp.lt.s32.totalorder %s438_s16, %s434_s15 }
   0xc   :  { %p441_p3 = por %p440_p2, %p439_p1 }
   0xe   :  { %p442_p4 = pnand %p441_p3, %p435_p0 }
  0x10   :  { %445 = shalt.err (!%p442_p4)
}
  0x11   :  { %43 = dma.hbm_to_vmem [thread:$0]  %s716_s2, 16, %s41_s12, [#allocation6]  }
  0x12   :  { %s454_s18 = scalar_lea.vmem %s63_s14, 16  ;;  %s458_s19 = scalar_lea.vmem %s63_s14, 32 }
  0x13   :  { %p455_p5 = scmp.ne.s32.totalorder %s63_s14, %s454_s18  ;;  %p459_p6 = scmp.lt.s32.totalorder %s63_s14, %s63_s14 }
  0x14   :  { %p460_p7 = scmp.lt.s32.totalorder %s458_s19, %s454_s18 }
  0x16   :  { %p461_p8 = por %p460_p7, %p459_p6 }
  0x18   :  { %p462_p9 = pnand %p461_p8, %p455_p5 }
  0x1a   :  { %465 = shalt.err (!%p462_p9)
}
  0x1b   :  { %65 = dma.hbm_to_vmem [thread:$0]  %s719_s5, 16, %s63_s14, [#allocation9]  }
  0x1c   :  { %s576_s22 = smov [#allocation11]   ;;  %s577_s24 = smov [#allocation3]  }
  0x1d   :  { %s82_s23 = sshll.u32 %s576_s22, 4  ;;  %s27_s25 = sshll.u32 %s577_s24, 4  ;;  %s83_s23 = int_to_ptr.vmem [resolvable:$true] %s82_s23  ;;  %s28_s25 = int_to_ptr.vmem [resolvable:$true] %s27_s25 }
  0x1e   :  { %s474_s26 = scalar_lea.vmem %s83_s23, 32  ;;  %p479_p11 = scmp.lt.s32.totalorder %s83_s23, %s83_s23 }
  0x1f   :  { %p475_p10 = scmp.ne.s32.totalorder %s83_s23, %s474_s26  ;;  %p480_p12 = scmp.lt.s32.totalorder %s474_s26, %s474_s26 }
  0x21   :  { %p481_p13 = por %p480_p12, %p479_p11 }
  0x23   :  { %p482_p0 = pnand %p481_p13, %p475_p10 }
  0x25   :  { %485 = shalt.err (!%p482_p0)
}
  0x26   :  { %85 = dma.hbm_to_vmem [thread:$0]  %s721_s7, 32, %s83_s23, [#allocation12]  }
  0x27   :  { %s494_s28 = scalar_lea.vmem %s28_s25, 128  ;;  %p499_p2 = scmp.lt.s32.totalorder %s28_s25, %s28_s25 }
  0x28   :  { %p495_p1 = scmp.ne.s32.totalorder %s28_s25, %s494_s28  ;;  %p500_p3 = scmp.lt.s32.totalorder %s494_s28, %s494_s28 }
  0x2a   :  { %p501_p4 = por %p500_p3, %p499_p2 }
  0x2c   :  { %p502_p5 = pnand %p501_p4, %p495_p1 }
  0x2e   :  { %505 = shalt.err (!%p502_p5)
}
  0x2f   :  { %s578_s5 = smov 64   ;;  %s579_s29 = smov 4  }
  0x30   :  { %33 = dma.hbm_to_vmem [thread:$0]  %s715_s1, 128, %s28_s25, [#allocation4], %s578_s5, %s578_s5, %s579_s29  }
  0x31   :  { %s580_s11 = smov [#allocation7]   ;;  %s581_s13 = smov [#allocation10]  }
  0x32   :  { %s50_s12 = sshll.u32 %s580_s11, 4  ;;  %s72_s14 = sshll.u32 %s581_s13, 4  ;;  %s51_s12 = int_to_ptr.vmem [resolvable:$true] %s50_s12  ;;  %s73_s14 = int_to_ptr.vmem [resolvable:$true] %s72_s14 }
  0x33   :  { %s514_s7 = scalar_lea.vmem %s51_s12, 16  ;;  %s518_s15 = scalar_lea.vmem %s51_s12, 32 }
  0x34   :  { %p515_p6 = scmp.ne.s32.totalorder %s51_s12, %s514_s7  ;;  %p519_p7 = scmp.lt.s32.totalorder %s51_s12, %s51_s12 }
  0x35   :  { %p520_p8 = scmp.lt.s32.totalorder %s518_s15, %s514_s7 }
  0x37   :  { %p521_p9 = por %p520_p8, %p519_p7 }
  0x39   :  { %p522_p10 = pnand %p521_p9, %p515_p6 }
  0x3b   :  { %525 = shalt.err (!%p522_p10)
}
  0x3c   :  { %53 = dma.hbm_to_vmem [thread:$0]  %s717_s3, 16, %s51_s12, [#allocation6]  }
  0x3d   :  { %s534_s17 = scalar_lea.vmem %s73_s14, 32  ;;  %p539_p12 = scmp.lt.s32.totalorder %s73_s14, %s73_s14 }
  0x3e   :  { %p535_p11 = scmp.ne.s32.totalorder %s73_s14, %s534_s17  ;;  %p540_p13 = scmp.lt.s32.totalorder %s534_s17, %s534_s17 }
  0x40   :  { %p541_p0 = por %p540_p13, %p539_p12 }
  0x42   :  { %p542_p1 = pnand %p541_p0, %p535_p11 }
  0x44   :  { %545 = shalt.err (!%p542_p1)
}
  0x45   :  { %75 = dma.hbm_to_vmem [thread:$0]  %s720_s6, 32, %s73_s14, [#allocation9]  }
  0x46   :  { %s582_s19 = smov [#allocation13]  }
  0x47   :  { %s92_s20 = sshll.u32 %s582_s19, 4  ;;  %s93_s20 = int_to_ptr.vmem [resolvable:$true] %s92_s20 }
  0x48   :  { %s554_s21 = scalar_lea.vmem %s93_s20, 16  ;;  %s558_s22 = scalar_lea.vmem %s93_s20, 32 }
  0x49   :  { %p555_p2 = scmp.ne.s32.totalorder %s93_s20, %s554_s21  ;;  %p559_p3 = scmp.lt.s32.totalorder %s93_s20, %s93_s20 }
  0x4a   :  { %p560_p4 = scmp.lt.s32.totalorder %s558_s22, %s554_s21 }
  0x4c   :  { %p561_p5 = por %p560_p4, %p559_p3 }
  0x4e   :  { %p562_p6 = pnand %p561_p5, %p555_p2 }
  0x50   :  { %565 = shalt.err (!%p562_p6)
}
  0x51   :  { %95 = dma.hbm_to_vmem [thread:$0]  %s722_s8, 16, %s93_s20, [#allocation12]  }
  0x52   :  { %566 = dma.done.wait [#allocation4], 128  }
  0x53   :  { %567 = vsyncadd [#allocation4], 4294967168 }
  0x54   :  { %568 = dma.done.wait [#allocation6], 32  }
  0x55   :  { %569 = vsyncadd [#allocation6], 4294967264 }
  0x56   :  { %570 = dma.done.wait [#allocation9], 48  }
  0x57   :  { %571 = vsyncadd [#allocation9], 4294967248 }
  0x58   :  { %572 = dma.done.wait [#allocation12], 48  }
  0x59   :  { %573 = vsyncadd [#allocation12], 4294967248  ;;  %v583_v1 = vmov 0   ;;  %v366_v2 = vld [vmem:[#allocation2] ss:$0 sm:$0xff]  ;;  %v380_v3 = vld [vmem:[#allocation3] sm:$0xff]   ;;  %v271_v60 = vlaneseq }
  0x5a   :  { %411 = vset.pattern.permute.xlu0 %v583_v1  ;;  %v381_v4 = vunpack.c.l.bf16 %v380_v3  ;;  %v382_v5 = vunpack.c.h.bf16 %v380_v3  ;;  %vm138_vm2 = vcmask 261120   ;;  %v412_v17 = vld [vmem:[%s718_s4 + $0x8] sm:$0xff]   ;;  %v584_v18 = vmov 0.0   ;;  %v413_v19 = vld [vmem:[%s718_s4] sm:$0xff]   ;;  %v374_v54 = vld [vmem:[#allocation10 + $0x1] ss:$0 sm:$0xff] }
  0x5b   :  { %131 = vperm.xlu0 %411, %v366_v2   ;;  %391 = vmatprep.subr.bf16.mxu0 %v584_v18  ;;  %vm585_vm3 = vmmov 0   ;;  %v367_v37 = vld [vmem:[#allocation5] ss:$0 sm:$0xff]  ;;  %v368_v42 = vld [vmem:[#allocation7] ss:$0 sm:$0xff]  ;;  %v272_v62 = vshrl.u32 %v271_v60, 7 }
  0x5c   :  { %vm123_vm0 = vcmp.gt.f32.partialorder %v382_v5, 0.0  ;;  %vm122_vm1 = vcmp.gt.f32.partialorder %v381_v4, 0.0  ;;  %395 = vmatprep.mubr.msk.bf16.mxu0 %vm585_vm3, %v584_v18  ;;  %392 = vmatpush3.bf16.msra.mxu0 %v412_v17  ;;  %v369_v47 = vld [vmem:[#allocation8] ss:$0 sm:$0xff]  ;;  %v373_v49 = vld [vmem:[#allocation10] ss:$0 sm:$0xff] }
  0x5d   :  { %393 = vmatprep.subr.bf16.mxu0 %v584_v18  ;;  %v268_v61 = vld [vmem:[#allocation11] sm:$0x1]  ;;  %v295_v63 = vld [vmem:[#allocation11 + $0x1] sm:$0x1]  ;;  %v273_v0 = vsub.s32 0, %v272_v62 }
  0x5e   :  { %vm269_vm4 = vcmp.ne.f32.partialorder %v268_v61, 0.0  ;;  %vm296_vm5 = vcmp.ne.f32.partialorder %v295_v63, 0.0 }
  0x5f   :  { %v270_v2 = vsel %vm269_vm4, 1, %v583_v1  ;;  %v297_v3 = vsel %vm296_vm5, 1, %v583_v1 }
  0x60   :  { %394 = vmatpush3.bf16.msra.mxu0 %v413_v19 }
  0xd6   :  { %v132_v6 = vpop.permute.xlu0 %131 }
  0xd7   :  { %v134_v7 = vmul.f32 %v381_v4, %v132_v6  ;;  %v135_v8 = vmul.f32 %v382_v5, %v132_v6  ;;  %v301_v6 = vrot.slane %v297_v3, %v273_v0 }
  0xd9   :  { %v137_v9 = vsel %vm123_vm0, %v382_v5, %v135_v8  ;;  %v136_v10 = vsel %vm122_vm1, %v381_v4, %v134_v7  ;;  %v256_v4 = vld [vmem:[#allocation13] sm:$0x1]  ;;  %v274_v5 = vrot.slane %v270_v2, %v273_v0  ;;  %vm686_vm7 = vcmp.eq.s32.totalorder %v301_v6, 1 }
  0xda   :  { %v142_v11 = vsel %vm138_vm2, %v137_v9, 0.0  ;;  %v139_v12 = vsel %vm138_vm2, %v136_v10, 0.0  ;;  %v148_v13 = vmul.f32 %v136_v10, %v136_v10  ;;  %v149_v15 = vmul.f32 %v137_v9, %v137_v9 }
  0xdb   :  { %143 = vadd.xlane.f32.xlu1 %v142_v11  ;;  %140 = vadd.xlane.f32.xlu0 %v139_v12  ;;  %v280_v7 = vrot.slane %v256_v4, %v273_v0  ;;  %vm682_vm6 = vcmp.eq.s32.totalorder %v274_v5, 1  ;;  %vm335_vm8 = vcmp.eq.f32.partialorder %v256_v4, 0.0 }
  0xdc   :  { %v150_v14 = vsel %vm138_vm2, %v148_v13, 0.0  ;;  %v153_v16 = vsel %vm138_vm2, %v149_v15, 0.0 }
  0xdf   :  { %151 = vadd.xlane.f32.xlu1 %v150_v14 }
  0xe3   :  { %154 = vadd.xlane.f32.xlu1 %v153_v16 }
 0x164   :  { %v144_v20 = vpop.xlane.xlu1 %143  ;;  %v141_v21 = vpop.xlane.xlu0 %140 }
 0x165   :  { %v146_v22 = vmul.f32 0.03125, %v141_v21  ;;  %v147_v24 = vmul.f32 0.03125, %v144_v20 }
 0x167   :  { %v158_v25 = vmul.f32 %v146_v22, %v146_v22  ;;  %v159_v29 = vmul.f32 %v147_v24, %v147_v24  ;;  %v162_v34 = vsub.f32 %v136_v10, %v146_v22  ;;  %v163_v38 = vsub.f32 %v137_v9, %v147_v24 }
 0x168   :  { %v152_v23 = vpop.xlane.xlu1 %151  ;;  %v326_v22 = vrot.slane %v295_v63, %v273_v0 }
 0x169   :  { %v156_v26 = vmul.f32 0.03125, %v152_v23  ;;  %v314_v23 = vrot.slane %v268_v61, %v273_v0 }
 0x16b   :  { %v160_v27 = vsub.f32 %v156_v26, %v158_v25 }
 0x16c   :  { %v155_v28 = vpop.xlane.xlu1 %154 }
 0x16d   :  { %v164_v30 = vadd.f32 1e-06, %v160_v27  ;;  %v157_v31 = vmul.f32 0.03125, %v155_v28 }
 0x16f   :  { %414 = vrsqrt.f32 %v164_v30  ;;  %v161_v32 = vsub.f32 %v157_v31, %v159_v29 }
 0x171   :  { %v165_v33 = vadd.f32 1e-06, %v161_v32 }
 0x173   :  { %416 = vrsqrt.f32 %v165_v33 }
 0x17c   :  { %v415_v35 = vpop.eup %414 }
 0x17d   :  { %v168_v36 = vmul.f32 %v415_v35, %v162_v34 }
 0x17f   :  { %v177_v41 = vmul.f32 %v367_v37, %v168_v36 }
 0x180   :  { %v417_v39 = vpop.eup %416 }
 0x181   :  { %v169_v40 = vmul.f32 %v417_v39, %v163_v38  ;;  %v186_v44 = vadd.f32 %v368_v42, %v177_v41  ;;  %v340_v38 = vsel %vm335_vm8, 1, %v583_v1 }
 0x183   :  { %v178_v43 = vmul.f32 %v367_v37, %v169_v40  ;;  %v344_v40 = vrot.slane %v340_v38, %v273_v0 }
 0x185   :  { %v187_v45 = vadd.f32 %v368_v42, %v178_v43  ;;  %vm345_vm9 = vcmp.eq.s32.totalorder %v344_v40, 1 }
 0x187   :  { %v188_v46 = vpack.c.bf16 %v187_v45, %v186_v44 }
 0x189   :  { %396 = vmatmul.mubr.msk.bf16.vlgmr.msra.gmra.mxu0 %vm138_vm2, %v188_v46 }
 0x249   :  { %v249_v48 = vpop.f32.mrf.mxu0 }
 0x24a   :  { %v672_v50 = vadd.f32 %v369_v47, %v249_v48 }
 0x24b   :  { %v397_v51 = vpop.f32.mrf.mxu0 }
 0x24c   :  { %v262_v52 = vadd.f32 %v373_v49, %v672_v50  ;;  %v289_v57 = vadd.f32 %v374_v54, %v672_v50 }
 0x24d   :  { %v252_v53 = vpop.f32.mrf.mxu0 }
 0x24e   :  { %264 = vmax.xlane.f32.xlu1 %v262_v52  ;;  %v675_v56 = vadd.f32 %v369_v47, %v252_v53 }
 0x24f   :  { %v398_v55 = vpop.f32.mrf.mxu0 }
 0x250   :  { %v263_v58 = vadd.f32 %v373_v49, %v675_v56  ;;  %v290_v59 = vadd.f32 %v374_v54, %v675_v56 }
 0x252   :  { %291 = vmax.xlane.f32.xlu1 %v289_v57 }
 0x256   :  { %266 = vmax.xlane.f32.xlu1 %v263_v58 }
 0x25a   :  { %293 = vmax.xlane.f32.xlu1 %v290_v59 }
 0x2d7   :  { %v265_v8 = vpop.xlane.xlu1 %264 }
 0x2d8   :  { %v282_v11 = vsel %vm682_vm6, %v265_v8, %v280_v7 }
 0x2db   :  { %v292_v12 = vpop.xlane.xlu1 %291 }
 0x2dc   :  { %v303_v13 = vsel %vm686_vm7, %v292_v12, %v282_v11 }
 0x2dd   :  { %v305_v14 = vsub.f32 %v672_v50, %v303_v13 }
 0x2df   :  { %v307_v15 = vmul.f32 1.442695, %v305_v14  ;;  %v267_v16 = vpop.xlane.xlu1 %266 }
 0x2e0   :  { %v283_v17 = vsel %vm682_vm6, %v267_v16, %v280_v7 }
 0x2e1   :  { %418 = vpow2.f32 %v307_v15 }
 0x2e3   :  { %v294_v18 = vpop.xlane.xlu1 %293 }
 0x2e4   :  { %v304_v19 = vsel %vm686_vm7, %v294_v18, %v283_v17 }
 0x2e5   :  { %v306_v20 = vsub.f32 %v675_v56, %v304_v19 }
 0x2e7   :  { %v309_v21 = vmul.f32 1.442695, %v306_v20 }
 0x2e9   :  { %420 = vpow2.f32 %v309_v21 }
 0x2ee   :  { %v419_v24 = vpop.eup %418 }
 0x2ef   :  { %v327_v25 = vmul.f32 %v419_v24, %v326_v22  ;;  %v315_v26 = vmul.f32 %v419_v24, %v314_v23 }
 0x2f1   :  { %329 = vadd.xlane.f32.xlu0 %v327_v25  ;;  %317 = vadd.xlane.f32.xlu1 %v315_v26 }
 0x2f6   :  { %v421_v27 = vpop.eup %420 }
 0x2f7   :  { %v316_v28 = vmul.f32 %v421_v27, %v314_v23  ;;  %v328_v29 = vmul.f32 %v421_v27, %v326_v22 }
 0x2f9   :  { %319 = vadd.xlane.f32.xlu1 %v316_v28 }
 0x2fd   :  { %331 = vadd.xlane.f32.xlu1 %v328_v29 }
 0x37a   :  { %v318_v30 = vpop.xlane.xlu1 %317  ;;  %v330_v31 = vpop.xlane.xlu0 %329 }
 0x37b   :  { %v321_v32 = vsel %vm682_vm6, %v318_v30, 1.0 }
 0x37c   :  { %v333_v33 = vsel %vm686_vm7, %v330_v31, %v321_v32 }
 0x37d   :  { %422 = vrcp.f32 %v333_v33 }
 0x382   :  { %v320_v34 = vpop.xlane.xlu1 %319 }
 0x383   :  { %v322_v35 = vsel %vm682_vm6, %v320_v34, 1.0 }
 0x386   :  { %v332_v36 = vpop.xlane.xlu1 %331 }
 0x387   :  { %v334_v37 = vsel %vm686_vm7, %v332_v36, %v322_v35 }
 0x388   :  { %424 = vrcp.f32 %v334_v37 }
 0x38a   :  { %v423_v39 = vpop.eup %422 }
 0x38b   :  { %v338_v41 = vmul.f32 %v423_v39, %v419_v24 }
 0x38d   :  { %v346_v44 = vsel %vm345_vm9, %v338_v41, %v672_v50 }
 0x395   :  { %v425_v42 = vpop.eup %424 }
 0x396   :  { %v339_v43 = vmul.f32 %v425_v42, %v421_v27 }
 0x398   :  { %v347_v45 = vsel %vm345_vm9, %v339_v43, %v675_v56 }
 0x399   :  { %v386_v46 = vpack.c.bf16 %v347_v45, %v346_v44 }
 0x39b   :  { %387 = vst [vmem:[%s723_s9] sm:$0xff] %v386_v46  }
 0x39c   :  { %362 = vsyncpa [#allocation4], 1 }
 0x39d   :  { %363 = vsyncpa [#allocation6], 1 }
 0x39e   :  { %364 = vsyncpa [#allocation9], 1 }
 0x39f   :  { %365 = vsyncpa [#allocation12], 1 }

</bundles_post_ra>
